<compile_context>
chip_gen: v6e
topology: v6e:2x2x1
jax: 0.10.0
libtpu: 0.0.40
codegen_flags: <defaults>
</compile_context>

<pallas_src>
import jax
import jax.numpy as jnp
from jax.experimental import pallas as pl
from jax.experimental.pallas import tpu as pltpu

# ---- model hyper-parameters (small, consistent with the module __init__) ----
D_MODEL = 32          # d_model
N_LAYER = 2           # n_layer (Orchid mixers; identity here, see TODO above)
VOCAB = 256           # vocab_size (pad_vocab_size_multiple=1 -> unchanged)
LN_EPS = 1e-5         # layer_norm_epsilon


def _pick_tile_m(m, target=2048):
    """Largest multiple-of-8 row tile <= target that divides m, preferring an
    EVEN number of row tiles so v7x can shard the 'parallel' axis evenly
    across its 2 TensorCores (v5e/v6e are unaffected by the even preference)."""
    divisors = [t for t in range(8, min(m, target) + 1, 8) if m % t == 0]
    if not divisors:
        return m
    even = [t for t in divisors if (m // t) % 2 == 0]
    return max(even) if even else max(divisors)


def _fused_lm_kernel(ids_ref, g_ref, o_ref):
    """ids -> (embed -> identity Orchid mixers -> LayerNorm -> tied lm_head)
    collapsed into one full-depth matmul against the precomputed table G.

    ids_ref : (TM, 1) int32   token ids for this row tile
    g_ref   : (V, V)  bf16    G = LayerNorm(E) @ E^T, VMEM-resident
    o_ref   : (TM, V) bf16    logits tile (lane-dense, 256-wide)
    """
    tm = ids_ref.shape[0]
    v = g_ref.shape[0]

    # Word-embedding gather expressed as a one-hot matmul on the MXU.
    # bf16 one-hot: 0/1 exactly representable -> exact row selection of G.
    ids = ids_ref[...]                                               # (TM, 1)
    iota = jax.lax.broadcasted_iota(jnp.int32, (tm, v), 1)           # (TM, V)
    onehot = (ids == iota).astype(jnp.bfloat16)                      # (TM, V)

    # Single K=256 full-depth MXU matmul, f32 accumulation, bf16 store.
    logits = jnp.dot(onehot, g_ref[...],
                     preferred_element_type=jnp.float32)             # (TM, V)
    o_ref[...] = logits.astype(o_ref.dtype)


def conv_lm_head_model_orchid_forward(input_ids, params):
    """Forward pass of ConvLMHeadModelOrchid (eval mode).

    Returns logits [B, L, V] in bf16 (f32-accumulated on the MXU)."""
    emb = params["word_embeddings"]              # [V, D] f32; tied lm_head weight
    gamma = params["ln_f_weight"]                # [1, D]
    beta = params["ln_f_bias"]                   # [1, D]
    B, L = input_ids.shape
    V, D = emb.shape
    M = B * L
    # NOTE: padded rows (if the caller pads B*L up to a multiple of 8) produce
    # valid-looking logits that must be masked downstream.
    assert M % 8 == 0, "token count must be a multiple of 8 for TPU sublanes"

    # --- n_layer OrchidOperator mixer layers are identity (see module TODO) --
    # so embed -> drop_f -> ln_f -> tied lm_head collapses to the table
    #   G = LayerNorm(E) @ E^T
    # precomputed ONCE here (LN math in f32), stored bf16 for the MXU.
    # TODO(synk): revert this fusion once OrchidOperator is implemented.
    mu = jnp.mean(emb, axis=-1, keepdims=True)
    var = jnp.mean(jnp.square(emb - mu), axis=-1, keepdims=True)
    e_ln = (emb - mu) * jax.lax.rsqrt(var + LN_EPS) * gamma + beta   # [V, D] f32
    G = jnp.dot(e_ln, emb.T,
                preferred_element_type=jnp.float32).astype(jnp.bfloat16)  # [V, V]

    tm = _pick_tile_m(M)
    grid = (M // tm,)
    ids2d = input_ids.reshape(M, 1).astype(jnp.int32)

    logits = pl.pallas_call(
        _fused_lm_kernel,
        out_shape=jax.ShapeDtypeStruct((M, V), jnp.bfloat16),
        grid_spec=pltpu.PrefetchScalarGridSpec(
            num_scalar_prefetch=0,
            grid=grid,
            in_specs=[
                pl.BlockSpec((tm, 1), lambda i: (i, 0)),   # token-id row tile
                pl.BlockSpec((V, V), lambda i: (0, 0)),    # G table, VMEM-resident
            ],
            out_specs=pl.BlockSpec((tm, V), lambda i: (i, 0)),  # lane-dense logits
        ),
        compiler_params=pltpu.CompilerParams(
            dimension_semantics=("parallel",)),
    )(ids2d, G)

    return logits.reshape(B, L, V)               # CausalLMOutput(logits=...)


def init_params(key):
    """Deterministic synthetic params matching _init_weights semantics."""
    (k_emb,) = jax.random.split(key, 1)
    return {
        # nn.Embedding init: normal(std=0.02); lm_head.weight is tied to this.
        "word_embeddings": (0.02 * jax.random.normal(
            k_emb, (VOCAB, D_MODEL))).astype(jnp.float32),
        # nn.LayerNorm defaults: weight=1, bias=0.
        "ln_f_weight": jnp.ones((1, D_MODEL), jnp.float32),
        "ln_f_bias": jnp.zeros((1, D_MODEL), jnp.float32),
    }


if __name__ == "__main__":
    key = jax.random.PRNGKey(0)
    k_params, k_ids = jax.random.split(key)
    params = init_params(k_params)

    B, L = 2, 8
    input_ids = jax.random.randint(k_ids, (B, L), 0, VOCAB, dtype=jnp.int32)

    logits = conv_lm_head_model_orchid_forward(input_ids, params)
    jax.block_until_ready(logits)

    # Pure-JAX f32 reference of embed -> (identity mixers) -> ln_f -> tied lm_head.
    h = jnp.take(params["word_embeddings"], input_ids.reshape(-1), axis=0)
    mu = jnp.mean(h, -1, keepdims=True)
    va = jnp.mean(jnp.square(h - mu), -1, keepdims=True)
    hn = ((h - mu) * jax.lax.rsqrt(va + LN_EPS) * params["ln_f_weight"]
          + params["ln_f_bias"])
    ref = hn @ params["word_embeddings"].T

    assert logits.shape == (B, L, VOCAB)
    assert logits.dtype == jnp.bfloat16
    # bf16 G table + bf16 logits output -> loosen tolerance vs f32 reference
    # (logit magnitudes are ~0.1, so 2e-2 absolute is a >1% relative margin).
    max_err = float(jnp.max(jnp.abs(
        logits.reshape(B * L, VOCAB).astype(jnp.float32) - ref)))
    assert max_err < 2e-2, f"max abs err {max_err}"

    print("KERNEL_OK")
</pallas_src>

<mosaic_0001>
module attributes {stable_mosaic.version = 11 : i64} {
  func.func @_fused_lm_kernel(%arg0: i32, %arg1: memref<8x1xi32, #tpu.memory_space<vmem>>, %arg2: memref<256x256xbf16, #tpu.memory_space<vmem>>, %arg3: memref<8x256xbf16, #tpu.memory_space<vmem>>) attributes {dimension_semantics = [#tpu.dimension_semantics<parallel>], iteration_bounds = array<i64: 2>, scalar_prefetch = 0 : i64, scratch_operands = 0 : i64, tpu.core_type = #tpu.core_type<tc>, window_params = [{transform_indices = @transform_0, window_bounds = array<i64: 8, 1>}, {pipeline_mode = #tpu.pipeline_mode<synchronous>, transform_indices = @transform_1, window_bounds = array<i64: 256, 256>}, {transform_indices = @transform_2, window_bounds = array<i64: 8, 256>}]} {
    %c0 = arith.constant 0 : index
    %c0_0 = arith.constant 0 : index
    %0 = vector.load %arg1[%c0, %c0_0] : memref<8x1xi32, #tpu.memory_space<vmem>>, vector<8x1xi32>
    %1 = tpu.iota {dimensions = array<i32: 1>} : vector<8x256xi32>
    %2 = vector.broadcast %0 : vector<8x1xi32> to vector<8x256xi32>
    %3 = arith.cmpi eq, %2, %1 : vector<8x256xi32>
    %4 = arith.extui %3 : vector<8x256xi1> to vector<8x256xi32>
    %5 = arith.sitofp %4 : vector<8x256xi32> to vector<8x256xf32>
    %6 = arith.truncf %5 : vector<8x256xf32> to vector<8x256xbf16>
    %c0_1 = arith.constant 0 : index
    %c0_2 = arith.constant 0 : index
    %7 = vector.load %arg2[%c0_1, %c0_2] : memref<256x256xbf16, #tpu.memory_space<vmem>>, vector<256x256xbf16>
    %cst = arith.constant dense<0.000000e+00> : vector<8x256xf32>
    %8 = tpu.matmul %6, %7, %cst {dimension_numbers = #tpu.dot_dimension_numbers<[1], [0], [0], [1], [0, 0, 1, 1], [], []>} : vector<8x256xbf16>, vector<256x256xbf16>, vector<8x256xf32> -> vector<8x256xf32>
    %9 = arith.truncf %8 : vector<8x256xf32> to vector<8x256xbf16>
    %c0_3 = arith.constant 0 : index
    %c0_4 = arith.constant 0 : index
    %10 = vector.load %arg3[%c0_3, %c0_4] : memref<8x256xbf16, #tpu.memory_space<vmem>>, vector<8x256xbf16>
    tpu.vector_store %arg3[%c0_3, %c0_4], %9 {strides = array<i32>} : memref<8x256xbf16, #tpu.memory_space<vmem>>, vector<8x256xbf16>,
    return
  }
  func.func @transform_0(%arg0: i32) -> (i32, i32) {
    %c0_i32 = arith.constant 0 : i32
    %c0_i32_0 = arith.constant 0 : i32
    return %arg0, %c0_i32 : i32, i32
  }
  func.func @transform_1(%arg0: i32) -> (i32, i32) {
    %c0_i32 = arith.constant 0 : i32
    %c0_i32_0 = arith.constant 0 : i32
    %c0_i32_1 = arith.constant 0 : i32
    return %c0_i32, %c0_i32_0 : i32, i32
  }
  func.func @transform_2(%arg0: i32) -> (i32, i32) {
    %c0_i32 = arith.constant 0 : i32
    %c0_i32_0 = arith.constant 0 : i32
    return %arg0, %c0_i32 : i32, i32
  }
}

</mosaic_0001>

<bundles_post_ra>
// kernel: tpu_custom_call.1
= control target key start
LH: loop header
LB: loop body
LE: loop exit
PB: predicated region body
PF: predicated region fallthrough
CT: control target
= control target key end

     0   :  { %7 = vsyncpa [#allocation3], 0  ;;  %s884_s0 = inlined_call_operand.vmem [shape: s32[16,1], index: 0, kind: input, shape index: {}]   ;;  %s885_s1 = inlined_call_operand.hbm [shape: bf16[256,256], index: 1, kind: input, shape index: {}]   ;;  %s886_s2 = inlined_call_operand.hbm [shape: bf16[16,256], index: 2, kind: output, shape index: {}]  }
   0x1   :  { %8 = vsyncpa [#allocation4], 0 }
   0x2   :  { %10 = vsyncpa [#allocation4 + $0x1], 0  ;;  %s767_s9 = smov 0   ;;  %s769_s10 = smov 0  }
   0x3   :  { %s771_s11 = smov 0   ;;  %s773_s12 = smov 0  }
   0x4 LB: > { %s788_s13 = sadd.s32 4294967295, %s744_s12   ;;  %s497_s14 = sadd.s32 4294967294, %s744_s12   ;;  %s744_s12 = sphi %s773_s12, %s894_s12   ;;  %s740_s11 = sphi %s771_s11, %s893_s11   ;;  %s736_s10 = sphi %s769_s10, %s892_s10   ;;  %s732_s9 = sphi %s767_s9, %s891_s9  }
   0x5   : > { %s792_s15 = sadd.s32 1, %s744_s12   ;;  %s70_s16 = sadd.s32 1, %s740_s11 }
   0x6   : > { %s67_s17 = ssub.s32 %s744_s12, %s792_s15  ;;  %p80_p0 = scmp.ne.s32.totalorder %s740_s11, %s736_s10 }
   0x7   : > { %p68_p1 = scmp.eq.s32.totalorder %s67_s17, 0  ;;  %p81_p2 = scmp.eq.s32.totalorder %s788_s13, 1 }
   0x8   : > { %p86_p3 = scmp.ne.s32.totalorder %s736_s10, %s732_s9  ;;  %p87_p4 = scmp.eq.s32.totalorder %s497_s14, 1 }
   0x9   : > { %s803_s18 = scalar_select %p68_p1, %s740_s11, %s70_s16  }
   0xa   : > { %p805_p5 = por %p81_p2, %p80_p0  ;;  %p809_p6 = por %p87_p4, %p86_p3 }
   0xb   : > { %p498_p7 = scmp.ge.s32.totalorder %s744_s12, 1  ;;  %p94_p8 = scmp.lt.s32.totalorder %s744_s12, 3 }
   0xc   : > { %s888_s20 = scalar_select %p809_p6, 1, 0 }
   0xd   : > { %p565_p9 = scmp.eq.s32.totalorder %s788_s13, 0  ;;  %p816_p10 = pnand %p498_p7, %p94_p8 }
   0xe   : > { %s746_s22 = smov [#allocation2]  }
   0xf   : > { %s106_s23 = sshll.u32 %s746_s22, 4  ;;  %p557_p11 = pneg %p816_p10  ;;  %s107_s23 = int_to_ptr.vmem [resolvable:$true] %s106_s23 }
  0x10   : > { %s665_s24 = scalar_lea.vmem %s107_s23, 4096  ;;  %p673_p3 = scmp.lt.s32.totalorder %s107_s23, %s107_s23 }
  0x11   : > { %p558_p12 = pnand %p565_p9, %p557_p11  ;;  %p666_p0 = scmp.ne.s32.totalorder %s107_s23, %s665_s24 }
  0x12   : > { %p674_p4 = scmp.lt.s32.totalorder %s665_s24, %s665_s24 }
  0x13   : > { %p656_p13 = pneg %p558_p12 }
  0x14   : > { %p675_p6 = por %p674_p4, %p673_p3 }
  0x15   : > { %p668_p1 = pnand %p666_p0, %p656_p13 }
  0x17   : > { %p669_p2 = pneg %p668_p1 }
  0x19   : > { %p676_p7 = pnand %p675_p6, %p669_p2 }
  0x1b   : > { %679 = shalt.err (!%p676_p7)
}
  0x1c   : > { %s747_s25 = smov 128   ;;  %s748_s26 = smov 8  }
  0x1d   : > { %560 = dma.hbm_to_vmem [thread:$0]  (!%p558_p12), %s885_s1, 4096, %s107_s23, [#allocation3], %s747_s25, %s747_s25, %s748_s26  }
  0x1e   : > { %129 = sbr.rel (%p816_p10) target bundleno = 382 (0x17e), region = 28 }
  0x23   : > { %723 = dma.done.wait (%p565_p9), [#allocation3], 4096  }
  0x24   : > { %725 = vsyncadd (%p565_p9), [#allocation3], 4294963200  ;;  %p150_p8 = scmp.lt.s32.totalorder %s788_s13, 1  ;;  %v749_v0 = vmov 0   ;;  %v606_v2 = vld [vmem:[#allocation2 + $0x74] ss:$8 sps:$4 sm:$0xff]   ;;  %v155_v34 = vlaneseq }
  0x25   : > { %605 = vset.pattern.permute.xlu0 %v749_v0  ;;  %v608_v3 = vld [vmem:[#allocation2 + $0x70] ss:$8 sps:$4 sm:$0xff]   ;;  %v609_v4 = vld [vmem:[#allocation2 + $0x64] ss:$8 sps:$4 sm:$0xff]   ;;  %361 = vmatprep.subr.bf16.mxu0 %v606_v2  ;;  %v611_v5 = vld [vmem:[#allocation2 + $0x60] ss:$8 sps:$4 sm:$0xff]  }
  0x26   : > { %s151_s29 = scalar_select %p150_p8, %s788_s13, 1  ;;  %362 = vmatpush1.bf16.msra.mxu0 %v608_v3  ;;  %v612_v6 = vld [vmem:[#allocation2 + $0x54] ss:$8 sps:$4 sm:$0xff]   ;;  %v614_v7 = vld [vmem:[#allocation2 + $0x50] ss:$8 sps:$4 sm:$0xff]   ;;  %v156_v35 = vand.u32 127, %v155_v34 }
  0x27   : > { %363 = vmatprep.subr.bf16.mxu0 %v609_v4  ;;  %v615_v8 = vld [vmem:[#allocation2 + $0x44] ss:$8 sps:$4 sm:$0xff]   ;;  %v617_v9 = vld [vmem:[#allocation2 + $0x40] ss:$8 sps:$4 sm:$0xff]   ;;  %v618_v10 = vld [vmem:[#allocation2 + $0x34] ss:$8 sps:$4 sm:$0xff]  }
  0x28   : > { %s504_s30 = sshll.u32 %s151_s29, 3  ;;  %v620_v11 = vld [vmem:[#allocation2 + $0x30] ss:$8 sps:$4 sm:$0xff]   ;;  %v621_v12 = vld [vmem:[#allocation2 + $0x24] ss:$8 sps:$4 sm:$0xff]   ;;  %v157_v36 = vadd.s32 128, %v156_v35 }
  0x29   : > { %s153_s5 = scalar_lea.vmem %s884_s0, %s504_s30  ;;  %v623_v13 = vld [vmem:[#allocation2 + $0x20] ss:$8 sps:$4 sm:$0xff]   ;;  %v624_v14 = vld [vmem:[#allocation2 + $0x14] ss:$8 sps:$4 sm:$0xff]   ;;  %v626_v15 = vld [vmem:[#allocation2 + $0x10] ss:$8 sps:$4 sm:$0xff]  }
  0x2a   : > { %v154_v1 = vld [vmem:[%s153_s5] sm:$0xff]  ;;  %364 = vmatpush1.bf16.msra.mxu0 %v611_v5  ;;  %v630_v18 = vld [vmem:[#allocation2 + $0xf4] ss:$8 sps:$4 sm:$0xff]   ;;  %v632_v19 = vld [vmem:[#allocation2 + $0xf0] ss:$8 sps:$4 sm:$0xff]   ;;  %s147_s6 = sand.u32 1, %s736_s10  }
  0x2b   : > { %159 = vperm.xlu0 %605, %v154_v1   ;;  %365 = vmatprep.subr.bf16.mxu0 %v612_v6  ;;  %v627_v16 = vld [vmem:[#allocation2 + $0x4] ss:$8 sps:$4 sm:$0xff]   ;;  %v629_v17 = vld [vmem:[#allocation2] ss:$8 sps:$4 sm:$0xff]   ;;  %v636_v22 = vld [vmem:[#allocation2 + $0xd4] ss:$8 sps:$4 sm:$0xff]  }
  0x2c   : > { %v633_v20 = vld [vmem:[#allocation2 + $0xe4] ss:$8 sps:$4 sm:$0xff]   ;;  %v635_v21 = vld [vmem:[#allocation2 + $0xe0] ss:$8 sps:$4 sm:$0xff]   ;;  %v638_v23 = vld [vmem:[#allocation2 + $0xd0] ss:$8 sps:$4 sm:$0xff]  }
  0x2d   : > { %v639_v24 = vld [vmem:[#allocation2 + $0xc4] ss:$8 sps:$4 sm:$0xff]   ;;  %v641_v25 = vld [vmem:[#allocation2 + $0xc0] ss:$8 sps:$4 sm:$0xff]   ;;  %v642_v26 = vld [vmem:[#allocation2 + $0xb4] ss:$8 sps:$4 sm:$0xff]  }
  0x2e   : > { %366 = vmatpush1.bf16.msra.mxu0 %v614_v7  ;;  %v644_v27 = vld [vmem:[#allocation2 + $0xb0] ss:$8 sps:$4 sm:$0xff]   ;;  %v645_v28 = vld [vmem:[#allocation2 + $0xa4] ss:$8 sps:$4 sm:$0xff]   ;;  %v647_v29 = vld [vmem:[#allocation2 + $0xa0] ss:$8 sps:$4 sm:$0xff]  }
  0x2f   : > { %367 = vmatprep.subr.bf16.mxu0 %v615_v8  ;;  %v648_v30 = vld [vmem:[#allocation2 + $0x94] ss:$8 sps:$4 sm:$0xff]   ;;  %v650_v31 = vld [vmem:[#allocation2 + $0x90] ss:$8 sps:$4 sm:$0xff]   ;;  %v651_v32 = vld [vmem:[#allocation2 + $0x84] ss:$8 sps:$4 sm:$0xff]  }
  0x30   : > { %v653_v33 = vld [vmem:[#allocation2 + $0x80] ss:$8 sps:$4 sm:$0xff]   ;;  %v750_v38 = vmov 1.0|1.0   ;;  %s503_s7 = sshll.u32 %s147_s6, 3  ;;  %s550_s8 = sshll.u32 %s788_s13, 7 }
  0x31   : > { %s149_s14 = scalar_lea.vmem [#allocation5], %s503_s7  ;;  %s843_s22 = scalar_lea.hbm %s886_s2, %s550_s8 }
  0x32   : > { %368 = vmatpush1.bf16.msra.mxu0 %v617_v9  ;;  %s426_s16 = sshll.u32 %s149_s14, 4  ;;  %s412_s23 = scalar_lea.sflag [#allocation4], %s147_s6  ;;  %s845_s16 = int_to_ptr.vmem [resolvable:$true] %s426_s16 }
  0x33   : > { %369 = vmatprep.subr.bf16.mxu0 %v618_v10  ;;  %s680_s24 = scalar_lea.vmem %s845_s16, 128  ;;  %s751_s13 = smov [#allocation5]  }
  0x34   : > { %p681_p6 = scmp.ne.s32.totalorder %s845_s16, %s680_s24  ;;  %s684_s25 = sshll.u32 %s751_s13, 4  ;;  %s685_s25 = int_to_ptr.vmem [resolvable:$false] %s684_s25 }
  0x35   : > { %s686_s26 = scalar_lea.vmem %s685_s25, 256  ;;  %p687_p11 = scmp.lt.s32.totalorder %s845_s16, %s685_s25 }
  0x36   : > { %370 = vmatpush1.bf16.msra.mxu0 %v620_v11  ;;  %p682_p9 = pnand %p681_p6, %p805_p5  ;;  %p688_p12 = scmp.lt.s32.totalorder %s686_s26, %s680_s24 }
  0x37   : > { %371 = vmatprep.subr.bf16.mxu0 %v621_v12 }
  0x38   : > { %p683_p10 = pneg %p682_p9  ;;  %p689_p13 = por %p688_p12, %p687_p11 }
  0x3a   : > { %372 = vmatpush1.bf16.msra.mxu0 %v623_v13  ;;  %p690_p0 = pnand %p689_p13, %p683_p10 }
  0x3b   : > { %373 = vmatprep.subr.bf16.mxu0 %v624_v14 }
  0x3e   : > { %374 = vmatpush1.bf16.msra.mxu0 %v626_v15 }
  0x3f   : > { %375 = vmatprep.subr.bf16.mxu0 %v627_v16 }
  0x42   : > { %376 = vmatpush1.bf16.msra.mxu0 %v629_v17 }
  0x43   : > { %377 = vmatprep.subr.bf16.mxu0 %v630_v18 }
  0x46   : > { %378 = vmatpush2.bf16.msra.mxu0 %v632_v19 }
  0x47   : > { %379 = vmatprep.subr.bf16.mxu0 %v633_v20 }
  0x4a   : > { %380 = vmatpush2.bf16.msra.mxu0 %v635_v21 }
  0x4b   : > { %381 = vmatprep.subr.bf16.mxu0 %v636_v22 }
  0x4e   : > { %382 = vmatpush2.bf16.msra.mxu0 %v638_v23 }
  0x4f   : > { %383 = vmatprep.subr.bf16.mxu0 %v639_v24 }
  0x52   : > { %384 = vmatpush2.bf16.msra.mxu0 %v641_v25 }
  0x53   : > { %385 = vmatprep.subr.bf16.mxu0 %v642_v26 }
  0x56   : > { %386 = vmatpush2.bf16.msra.mxu0 %v644_v27 }
  0x57   : > { %387 = vmatprep.subr.bf16.mxu0 %v645_v28 }
  0x5a   : > { %388 = vmatpush2.bf16.msra.mxu0 %v647_v29 }
  0x5b   : > { %389 = vmatprep.subr.bf16.mxu0 %v648_v30 }
  0x5e   : > { %390 = vmatpush2.bf16.msra.mxu0 %v650_v31 }
  0x5f   : > { %391 = vmatprep.subr.bf16.mxu0 %v651_v32 }
  0x62   : > { %392 = vmatpush2.bf16.msra.mxu0 %v653_v33 }
  0xa6   : > { %v160_v37 = vpop.permute.xlu0 %159 }
  0xa7   : > { %vm161_vm0 = vcmp.eq.s32.totalorder %v160_v37, %v156_v35  ;;  %vm162_vm1 = vcmp.eq.s32.totalorder %v160_v37, %v157_v36 }
  0xa8   : > { %vm541_vm2 = vmpackc.low %vm161_vm0, %vm161_vm0 }
  0xa9   : > { %vm539_vm3 = vmpackc.low %vm162_vm1, %vm162_vm1 }
  0xaa   : > { %540 = vmatprep.mubr.msk.bf16.mxu0 %vm539_vm3, %v750_v38 }
  0xab   : > { %542 = vmatmul.mubr.msk.bf16.vlgmr.msra.gmra.mxu0 %vm541_vm2, %v750_v38 }
 0x16b   : > { %v395_v39 = vpop.f32.mrf.mxu0 }
 0x16d   : > { %v397_v40 = vpop.f32.mrf.mxu0 }
 0x16e   : > { %v549_v41 = vpack.c.bf16 %v397_v40, %v395_v39 }
 0x16f   : > { %v399_v42 = vpop.f32.mrf.mxu0 }
 0x170   : > { %410 = vst [vmem:[%s149_s14] sm:$0xff] %v549_v41 }
 0x171   : > { %v400_v43 = vpop.f32.mrf.mxu0 }
 0x172   : > { %693 = shalt.err (!%p690_p0)
}
 0x173   : > { %s694_s27 = scalar_lea.hbm %s843_s22, 128  ;;  %s698_s30 = scalar_lea.hbm %s886_s2, 256 }
 0x174   : > { %p695_p1 = scmp.ne.s32.totalorder %s843_s22, %s694_s27  ;;  %p699_p4 = scmp.lt.s32.totalorder %s843_s22, %s886_s2 }
 0x175   : > { %p700_p7 = scmp.lt.s32.totalorder %s698_s30, %s694_s27 }
 0x176   : > { %p696_p2 = pnand %p695_p1, %p805_p5 }
 0x177   : > { %p701_p8 = por %p700_p7, %p699_p4 }
 0x178   : > { %p697_p3 = pneg %p696_p2 }
 0x17a   : > { %p702_p6 = pnand %p701_p8, %p697_p3 }
 0x17c   : > { %705 = shalt.err (!%p702_p6)
}
 0x17d   : > { %555 = dma.vmem_to_hbm [thread:$0]  (%p805_p5), %s845_s16, 128, %s843_s22, %s412_s23  }
 0x17e PF: > { %p567_p9 = scmp.ge.s32.totalorder %s744_s12, 2  ;;  %s438_s5 = sand.u32 1, %s732_s9  }
 0x17f   : > { %p890_p10 = scmp.ne.s32.totalorder %s888_s20, 0  ;;  %s439_s6 = scalar_lea.sflag [#allocation4], %s438_s5 }
 0x181   : > { %p562_p11 = pnand %p567_p9, %p890_p10 }
 0x183   : > { %p563_p12 = pneg %p562_p11 }
 0x185   : > { %727 = dma.done.wait (%p563_p12), %s439_s6, 128  }
 0x186   : > { %729 = vsyncadd (%p563_p12), %s439_s6, 4294967168  ;;  %p13_p13 = scmp.ge.s32.totalorder %s792_s15, 4   ;;  %s891_s9 = smov %s736_s10 }
 0x187   : > { %s892_s10 = smov %s740_s11  ;;  %s893_s11 = smov %s803_s18 }
 0x188   : > { %s894_s12 = smov %s792_s15  ;;  %15 = sbr.rel (!%p13_p13) target bundleno = 4 (0x4), region = 68 }
 0x18d   :  { %444 = vsyncpa [#allocation3], 1 }
 0x18e   :  { %446 = vsyncpa [#allocation3 + $0x1], 1 }
 0x18f   :  { %447 = vsyncpa [#allocation4], 1 }
 0x190   :  { %449 = vsyncpa [#allocation4 + $0x1], 1 }

</bundles_post_ra>
